<compile_context>
chip_gen: v6e
topology: v6e:2x2x1
jax: 0.10.0
libtpu: 0.0.40
codegen_flags: <defaults>
</compile_context>

<pallas_src>
import functools
import math

import jax
import jax.numpy as jnp
from jax import lax
from jax.experimental import pallas as pl
from jax.experimental.pallas import tpu as pltpu

LN_EPS = 1e-12
NEG_INF = -1e9


# ----------------------------- in-kernel helpers -----------------------------

def _layer_norm(x, gamma, beta):
    mean = jnp.mean(x, axis=-1, keepdims=True)
    var = jnp.mean(jnp.square(x - mean), axis=-1, keepdims=True)
    return (x - mean) * lax.rsqrt(var + LN_EPS) * gamma + beta


def _gelu(x):
    # TODO(synk): HF DistilBERT uses the exact (erf) GELU; tanh approximation used here.
    c = math.sqrt(2.0 / math.pi)
    return 0.5 * x * (1.0 + jnp.tanh(c * (x + 0.044715 * x * x * x)))


# ----------------------------- spec / config helpers --------------------------

@functools.lru_cache(maxsize=None)
def _vmem_limit_bytes():
    """Generation-aware scoped-VMEM limit (leave headroom for internal scratch)."""
    cap = 128 * 1024 * 1024
    try:
        cap = int(getattr(pltpu.get_tpu_info(), "vmem_capacity_bytes", cap))
    except Exception:
        pass
    return min(48 * 1024 * 1024, max(cap // 2, 16 * 1024 * 1024))


def _const_weight_spec(w):
    """Weight block whose index is constant across the grid -> single buffer."""
    nd = w.ndim
    index_map = lambda b, c, _nd=nd: (0,) * _nd
    try:
        return pl.BlockSpec(w.shape, index_map, pipeline_mode=pl.Buffered(1))
    except Exception:  # older JAX without pipeline_mode / Buffered
        return pl.BlockSpec(w.shape, index_map)


def _full_spec(shape):
    nd = len(shape)
    return pl.BlockSpec(shape, lambda *_: (0,) * nd)


def _pick_ffn_chunk(ffn):
    for c in (1024, 512, 256):
        if ffn % c == 0:
            return c
    return ffn


# ------------------------------- Pallas kernels -------------------------------

def _emb_ln_kernel(x_ref, g_ref, b_ref, o_ref):
    o_ref[...] = _layer_norm(x_ref[...], g_ref[...], b_ref[...]).astype(o_ref.dtype)


def _encoder_layer_kernel(x_ref, mb_ref,
                          wqkv_ref, bqkv_ref, wo_ref, bo_ref,
                          ln1g_ref, ln1b_ref,
                          w1_ref, b1_ref, w2_ref, b2_ref,
                          ln2g_ref, ln2b_ref,
                          o_ref,
                          h1_ref, acc_ref,
                          *, num_heads, head_dim):
    c = pl.program_id(1)
    n_chunks = pl.num_programs(1)
    H = num_heads * head_dim
    S = x_ref.shape[1]

    # -------- attention + first LayerNorm: once per batch element -----------
    @pl.when(c == 0)
    def _attention():
        xb = x_ref[0]                       # (S, H) bf16 MXU operand
        x = xb.astype(jnp.float32)          # f32 residual / LN math
        # Hoisted mask broadcast (JAX does not CSE broadcast_in_dim).
        mb = jnp.broadcast_to(mb_ref[0], (S, S))            # (S, S) f32 bias

        # Fused Q|K|V projection (scale already folded into the Q slice).
        qkv = jnp.dot(xb, wqkv_ref[...],
                      preferred_element_type=jnp.float32) + bqkv_ref[...]
        qkvb = qkv.astype(jnp.bfloat16)

        # Per-head attention; context concatenated lane-dense before Wo.
        # TODO(synk): batch heads into one (nh, S, hd) dot_general at
        # production dims (hd=64) to raise MXU utilization on 256-wide MXUs.
        ctx_parts = []
        for h in range(num_heads):
            qs = slice(h * head_dim, (h + 1) * head_dim)
            ks = slice(H + h * head_dim, H + (h + 1) * head_dim)
            vs = slice(2 * H + h * head_dim, 2 * H + (h + 1) * head_dim)
            s = lax.dot_general(qkvb[:, qs], qkvb[:, ks],
                                dimension_numbers=(((1,), (1,)), ((), ())),
                                preferred_element_type=jnp.float32) + mb
            s = s - jnp.max(s, axis=-1, keepdims=True)
            p = jnp.exp(s)
            p = p * pl.reciprocal(jnp.sum(p, axis=-1, keepdims=True), approx=True)
            ctx_parts.append(jnp.dot(p.astype(jnp.bfloat16), qkvb[:, vs],
                                     preferred_element_type=jnp.float32))
        ctx = jnp.concatenate(ctx_parts, axis=-1)            # (S, H) f32

        attn = jnp.dot(ctx.astype(jnp.bfloat16), wo_ref[...],
                       preferred_element_type=jnp.float32) + bo_ref[...]
        h1_ref[...] = _layer_norm(x + attn, ln1g_ref[...], ln1b_ref[...])
        acc_ref[...] = jnp.zeros_like(acc_ref)

    # -------- FFN chunk: w1/w2 tiles streamed in via the chunk grid axis ----
    h1b = h1_ref[...].astype(jnp.bfloat16)
    ff = jnp.dot(h1b, w1_ref[...], preferred_element_type=jnp.float32) + b1_ref[...]
    ff = _gelu(ff)
    acc_ref[...] += jnp.dot(ff.astype(jnp.bfloat16), w2_ref[...],
                            preferred_element_type=jnp.float32)

    # -------- residual + second LayerNorm on the last chunk -----------------
    @pl.when(c == n_chunks - 1)
    def _finish():
        ff_out = acc_ref[...] + b2_ref[...]
        o_ref[0] = _layer_norm(h1_ref[...] + ff_out,
                               ln2g_ref[...], ln2b_ref[...]).astype(o_ref.dtype)


def _cls_logits_kernel(x_ref, w_ref, b_ref, logits_ref):
    logits_ref[...] = jnp.dot(x_ref[...], w_ref[...],
                              preferred_element_type=jnp.float32) + b_ref[...]


def _cls_loss_kernel(x_ref, w_ref, b_ref, oh_ref, logits_ref, loss_ref):
    logits = jnp.dot(x_ref[...], w_ref[...],
                     preferred_element_type=jnp.float32) + b_ref[...]
    logits_ref[...] = logits                                   # (B, Cp) lane-dense
    m = jnp.max(logits, axis=-1, keepdims=True)
    lse = jnp.log(jnp.sum(jnp.exp(logits - m), axis=-1, keepdims=True)) + m
    nll = jnp.sum(oh_ref[...] * (lse - logits), axis=-1, keepdims=True)   # (B, 1)
    loss_ref[0, 0] = jnp.sum(nll) / x_ref.shape[0]             # scalar to SMEM


# ------------------------------ pallas_call glue ------------------------------

def embeddings_layernorm(x, gamma, beta):
    """Row-tiled LayerNorm over the flattened (B*S, H) embeddings; bf16 out."""
    B, S, H = x.shape
    rows = B * S
    x2 = x.reshape(rows, H)
    rows_p = ((rows + 7) // 8) * 8
    if rows_p != rows:                       # pad instead of whole-array fallback
        x2 = jnp.pad(x2, ((0, rows_p - rows), (0, 0)))

    tile = 8
    while tile * 2 <= min(rows_p, 1024) and rows_p % (tile * 2) == 0:
        tile *= 2

    out = pl.pallas_call(
        _emb_ln_kernel,
        out_shape=jax.ShapeDtypeStruct((rows_p, H), jnp.bfloat16),
        grid=(rows_p // tile,),
        in_specs=[pl.BlockSpec((tile, H), lambda i: (i, 0)),
                  pl.BlockSpec((1, H), lambda i: (0, 0)),
                  pl.BlockSpec((1, H), lambda i: (0, 0))],
        out_specs=pl.BlockSpec((tile, H), lambda i: (i, 0)),
        compiler_params=pltpu.CompilerParams(dimension_semantics=("parallel",)),
    )(x2, gamma, beta)
    return out[:rows].reshape(B, S, H)


def encoder_layer(hidden, mask_bias, lw, *, num_heads):
    """One transformer block; grid = (batch, ffn_chunk). hidden is bf16."""
    B, S, H = hidden.shape
    head_dim = H // num_heads
    ffn = lw["w1"].shape[1]
    ffn_chunk = _pick_ffn_chunk(ffn)
    n_chunks = ffn // ffn_chunk

    kernel = functools.partial(_encoder_layer_kernel,
                               num_heads=num_heads, head_dim=head_dim)

    in_specs = [
        pl.BlockSpec((1, S, H), lambda b, c: (b, 0, 0)),          # hidden (bf16)
        pl.BlockSpec((1, 1, S), lambda b, c: (b, 0, 0)),          # mask bias (f32)
        _const_weight_spec(lw["wqkv"]), _const_weight_spec(lw["bqkv"]),
        _const_weight_spec(lw["wo"]), _const_weight_spec(lw["bo"]),
        _const_weight_spec(lw["ln1_g"]), _const_weight_spec(lw["ln1_b"]),
        pl.BlockSpec((H, ffn_chunk), lambda b, c: (0, c)),        # w1 chunk (streamed)
        pl.BlockSpec((1, ffn_chunk), lambda b, c: (0, c)),        # b1 chunk
        pl.BlockSpec((ffn_chunk, H), lambda b, c: (c, 0)),        # w2 chunk (streamed)
        _const_weight_spec(lw["b2"]),
        _const_weight_spec(lw["ln2_g"]), _const_weight_spec(lw["ln2_b"]),
    ]

    return pl.pallas_call(
        kernel,
        out_shape=jax.ShapeDtypeStruct((B, S, H), jnp.bfloat16),
        grid=(B, n_chunks),
        in_specs=in_specs,
        out_specs=pl.BlockSpec((1, S, H), lambda b, c: (b, 0, 0)),
        scratch_shapes=[pltpu.VMEM((S, H), jnp.float32),          # post-attn LN result
                        pltpu.VMEM((S, H), jnp.float32)],         # FFN accumulator
        compiler_params=pltpu.CompilerParams(
            dimension_semantics=("parallel", "arbitrary"),
            vmem_limit_bytes=_vmem_limit_bytes()),
    )(hidden, mask_bias,
      lw["wqkv"], lw["bqkv"], lw["wo"], lw["bo"], lw["ln1_g"], lw["ln1_b"],
      lw["w1"], lw["b1"], lw["w2"], lw["b2"], lw["ln2_g"], lw["ln2_b"])


def classifier_forward(pooled, wc_p, bc_p, num_labels, onehot=None):
    """Classifier head; loss only computed when one-hot labels are provided."""
    B, H = pooled.shape
    Cp = wc_p.shape[1]

    if onehot is None:
        logits = pl.pallas_call(
            _cls_logits_kernel,
            out_shape=jax.ShapeDtypeStruct((B, Cp), jnp.float32),
            in_specs=[_full_spec((B, H)), _full_spec((H, Cp)), _full_spec((1, Cp))],
            out_specs=_full_spec((B, Cp)),
        )(pooled, wc_p, bc_p)
        return logits[:, :num_labels], None

    logits, loss = pl.pallas_call(
        _cls_loss_kernel,
        out_shape=(jax.ShapeDtypeStruct((B, Cp), jnp.float32),
                   jax.ShapeDtypeStruct((1, 1), jnp.float32)),
        in_specs=[_full_spec((B, H)), _full_spec((H, Cp)),
                  _full_spec((1, Cp)), _full_spec((B, Cp))],
        out_specs=(_full_spec((B, Cp)),
                   pl.BlockSpec(memory_space=pltpu.MemorySpace.SMEM)),
    )(pooled, wc_p, bc_p, onehot)
    return logits[:, :num_labels], loss[0, 0]


# ------------------------------ parameters & model -----------------------------

def init_params(key, *, vocab_size, max_pos, hidden, ffn, num_layers, num_labels):
    n_keys = 3 + num_layers
    keys = jax.random.split(key, n_keys)

    def dense(k, fan_in, fan_out):
        kw, kb = jax.random.split(k)
        w = jax.random.normal(kw, (fan_in, fan_out), jnp.float32) * 0.02
        b = jax.random.normal(kb, (1, fan_out), jnp.float32) * 0.02
        return w, b

    params = {
        "word_emb": jax.random.normal(keys[0], (vocab_size, hidden), jnp.float32) * 0.02,
        "pos_emb": jax.random.normal(keys[1], (max_pos, hidden), jnp.float32) * 0.02,
        "emb_ln_g": jnp.ones((1, hidden), jnp.float32),
        "emb_ln_b": jnp.zeros((1, hidden), jnp.float32),
    }
    cls_w, cls_b = dense(keys[2], hidden, num_labels)
    params["cls_w"], params["cls_b"] = cls_w, cls_b

    layers = []
    for i in range(num_layers):
        lk = jax.random.split(keys[3 + i], 6)
        wq, bq = dense(lk[0], hidden, hidden)
        wk, bk = dense(lk[1], hidden, hidden)
        wv, bv = dense(lk[2], hidden, hidden)
        wo, bo = dense(lk[3], hidden, hidden)
        w1, b1 = dense(lk[4], hidden, ffn)
        w2, b2 = dense(lk[5], ffn, hidden)
        layers.append({
            "wq": wq, "bq": bq, "wk": wk, "bk": bk, "wv": wv, "bv": bv,
            "wo": wo, "bo": bo,
            "ln1_g": jnp.ones((1, hidden), jnp.float32),
            "ln1_b": jnp.zeros((1, hidden), jnp.float32),
            "w1": w1, "b1": b1, "w2": w2, "b2": b2,
            "ln2_g": jnp.ones((1, hidden), jnp.float32),
            "ln2_b": jnp.zeros((1, hidden), jnp.float32),
        })
    params["layers"] = layers
    return params


def prepare_inference_params(params, *, num_heads):
    """One-time weight prep: fold attention scale into Wq/bq, fuse Q|K|V into a
    single (H, 3H) weight, cast matmul weights to bf16, pad classifier to a
    lane-dense 128-wide block.  Run once; reuse the returned pytree every call."""
    hidden = params["word_emb"].shape[1]
    head_dim = hidden // num_heads
    scale = 1.0 / math.sqrt(head_dim)
    bf16 = jnp.bfloat16

    C = params["cls_w"].shape[1]
    Cp = ((C + 127) // 128) * 128
    fast = {
        "word_emb": params["word_emb"],
        "pos_emb": params["pos_emb"],
        "emb_ln_g": params["emb_ln_g"],
        "emb_ln_b": params["emb_ln_b"],
        "num_labels": C,
        "cls_w": jnp.pad(params["cls_w"], ((0, 0), (0, Cp - C))).astype(bf16),
        "cls_b": jnp.pad(params["cls_b"], ((0, 0), (0, Cp - C)),
                         constant_values=NEG_INF),            # padded classes -> -inf-ish
    }
    layers = []
    for lw in params["layers"]:
        layers.append({
            "wqkv": jnp.concatenate(
                [lw["wq"] * scale, lw["wk"], lw["wv"]], axis=1).astype(bf16),
            "bqkv": jnp.concatenate(
                [lw["bq"] * scale, lw["bk"], lw["bv"]], axis=1),
            "wo": lw["wo"].astype(bf16), "bo": lw["bo"],
            "ln1_g": lw["ln1_g"], "ln1_b": lw["ln1_b"],
            "w1": lw["w1"].astype(bf16), "b1": lw["b1"],
            "w2": lw["w2"].astype(bf16), "b2": lw["b2"],
            "ln2_g": lw["ln2_g"], "ln2_b": lw["ln2_b"],
        })
    fast["layers"] = layers
    return fast


def distilbert_classifier_forward(fast_params, input_ids, attention_mask,
                                  labels=None, *, num_heads):
    B, S = input_ids.shape
    # Embedding gathers are JAX glue (data-dependent lookup); LN + encoder are Pallas.
    emb = (fast_params["word_emb"][input_ids]
           + fast_params["pos_emb"][jnp.arange(S)][None])
    hidden = embeddings_layernorm(emb.astype(jnp.float32),
                                  fast_params["emb_ln_g"], fast_params["emb_ln_b"])

    # Additive mask bias stays f32 so masking survives the bf16 score operands.
    mask_bias = jnp.where(attention_mask == 0, NEG_INF, 0.0).astype(jnp.float32)[:, None, :]
    for lw in fast_params["layers"]:
        hidden = encoder_layer(hidden, mask_bias, lw, num_heads=num_heads)

    pooled = hidden[:, 0]                       # last_hidden_state[:, 0] (CLS token)
    C = fast_params["num_labels"]

    if labels is None:
        logits, _ = classifier_forward(pooled, fast_params["cls_w"],
                                       fast_params["cls_b"], C, None)
        return logits

    onehot = jax.nn.one_hot(labels, fast_params["cls_w"].shape[1], dtype=jnp.float32)
    logits, loss = classifier_forward(pooled, fast_params["cls_w"],
                                      fast_params["cls_b"], C, onehot)
    return loss, logits


# ------------------------------------ main ------------------------------------

if __name__ == "__main__":
    B, S = 2, 8
    HIDDEN, FFN, NUM_HEADS, NUM_LAYERS = 32, 64, 4, 2
    VOCAB, MAX_POS, NUM_LABELS = 100, 64, 4

    key = jax.random.PRNGKey(0)
    pkey, ikey, lkey = jax.random.split(key, 3)

    params = init_params(pkey, vocab_size=VOCAB, max_pos=MAX_POS, hidden=HIDDEN,
                         ffn=FFN, num_layers=NUM_LAYERS, num_labels=NUM_LABELS)
    fast_params = prepare_inference_params(params, num_heads=NUM_HEADS)

    input_ids = jax.random.randint(ikey, (B, S), 0, VOCAB, dtype=jnp.int32)
    attention_mask = jnp.array([[1, 1, 1, 1, 1, 1, 0, 0],
                                [1, 1, 1, 1, 1, 1, 1, 1]], dtype=jnp.int32)
    labels = jax.random.randint(lkey, (B,), 0, NUM_LABELS, dtype=jnp.int32)

    loss, logits = distilbert_classifier_forward(
        fast_params, input_ids, attention_mask, labels, num_heads=NUM_HEADS)
    logits_only = distilbert_classifier_forward(
        fast_params, input_ids, attention_mask, None, num_heads=NUM_HEADS)

    jax.block_until_ready((loss, logits, logits_only))
    assert logits.shape == (B, NUM_LABELS) and loss.shape == ()
    assert logits_only.shape == (B, NUM_LABELS)
    print("KERNEL_OK")
</pallas_src>

<mosaic_0001>
module attributes {stable_mosaic.version = 11 : i64} {
  func.func @_emb_ln_kernel(%arg0: i32, %arg1: memref<16x32xf32, #tpu.memory_space<vmem>>, %arg2: memref<1x32xf32, #tpu.memory_space<vmem>>, %arg3: memref<1x32xf32, #tpu.memory_space<vmem>>, %arg4: memref<16x32xbf16, #tpu.memory_space<vmem>>) attributes {dimension_semantics = [#tpu.dimension_semantics<parallel>], iteration_bounds = array<i64: 1>, scalar_prefetch = 0 : i64, scratch_operands = 0 : i64, tpu.core_type = #tpu.core_type<tc>, window_params = [{transform_indices = @transform_0, window_bounds = array<i64: 16, 32>}, {pipeline_mode = #tpu.pipeline_mode<synchronous>, transform_indices = @transform_1, window_bounds = array<i64: 1, 32>}, {pipeline_mode = #tpu.pipeline_mode<synchronous>, transform_indices = @transform_2, window_bounds = array<i64: 1, 32>}, {transform_indices = @transform_3, window_bounds = array<i64: 16, 32>}]} {
    %c0 = arith.constant 0 : index
    %c0_0 = arith.constant 0 : index
    %0 = vector.load %arg1[%c0, %c0_0] : memref<16x32xf32, #tpu.memory_space<vmem>>, vector<16x32xf32>
    %c0_1 = arith.constant 0 : index
    %c0_2 = arith.constant 0 : index
    %1 = vector.load %arg2[%c0_1, %c0_2] : memref<1x32xf32, #tpu.memory_space<vmem>>, vector<1x32xf32>
    %c0_3 = arith.constant 0 : index
    %c0_4 = arith.constant 0 : index
    %2 = vector.load %arg3[%c0_3, %c0_4] : memref<1x32xf32, #tpu.memory_space<vmem>>, vector<1x32xf32>
    %cst = arith.constant dense<0.000000e+00> : vector<16xf32>
    %3 = vector.multi_reduction <add>, %0, %cst [1] : vector<16x32xf32> to vector<16xf32>
    %4 = vector.shape_cast %3 : vector<16xf32> to vector<16x1xf32>
    %cst_5 = arith.constant 3.200000e+01 : f32
    %5 = vector.broadcast %cst_5 : f32 to vector<16x1xf32>
    %6 = arith.divf %4, %5 : vector<16x1xf32>
    %7 = vector.broadcast %6 : vector<16x1xf32> to vector<16x32xf32>
    %8 = arith.subf %0, %7 : vector<16x32xf32>
    %9 = arith.mulf %8, %8 : vector<16x32xf32>
    %cst_6 = arith.constant dense<0.000000e+00> : vector<16xf32>
    %10 = vector.multi_reduction <add>, %9, %cst_6 [1] : vector<16x32xf32> to vector<16xf32>
    %11 = vector.shape_cast %10 : vector<16xf32> to vector<16x1xf32>
    %cst_7 = arith.constant 3.200000e+01 : f32
    %12 = vector.broadcast %cst_7 : f32 to vector<16x1xf32>
    %13 = arith.divf %11, %12 : vector<16x1xf32>
    %14 = vector.broadcast %6 : vector<16x1xf32> to vector<16x32xf32>
    %15 = arith.subf %0, %14 : vector<16x32xf32>
    %cst_8 = arith.constant 9.99999996E-13 : f32
    %16 = vector.broadcast %cst_8 : f32 to vector<16x1xf32>
    %17 = arith.addf %13, %16 : vector<16x1xf32>
    %18 = math.rsqrt %17 : vector<16x1xf32>
    %19 = vector.broadcast %18 : vector<16x1xf32> to vector<16x32xf32>
    %20 = arith.mulf %15, %19 : vector<16x32xf32>
    %21 = vector.broadcast %1 : vector<1x32xf32> to vector<16x32xf32>
    %22 = arith.mulf %20, %21 : vector<16x32xf32>
    %23 = vector.broadcast %2 : vector<1x32xf32> to vector<16x32xf32>
    %24 = arith.addf %22, %23 : vector<16x32xf32>
    %25 = arith.truncf %24 : vector<16x32xf32> to vector<16x32xbf16>
    %c0_9 = arith.constant 0 : index
    %c0_10 = arith.constant 0 : index
    %26 = vector.load %arg4[%c0_9, %c0_10] : memref<16x32xbf16, #tpu.memory_space<vmem>>, vector<16x32xbf16>
    tpu.vector_store %arg4[%c0_9, %c0_10], %25 {strides = array<i32>} : memref<16x32xbf16, #tpu.memory_space<vmem>>, vector<16x32xbf16>,
    return
  }
  func.func @transform_0(%arg0: i32) -> (i32, i32) {
    %c0_i32 = arith.constant 0 : i32
    %c0_i32_0 = arith.constant 0 : i32
    return %arg0, %c0_i32 : i32, i32
  }
  func.func @transform_1(%arg0: i32) -> (i32, i32) {
    %c0_i32 = arith.constant 0 : i32
    %c0_i32_0 = arith.constant 0 : i32
    %c0_i32_1 = arith.constant 0 : i32
    return %c0_i32, %c0_i32_0 : i32, i32
  }
  func.func @transform_2(%arg0: i32) -> (i32, i32) {
    %c0_i32 = arith.constant 0 : i32
    %c0_i32_0 = arith.constant 0 : i32
    %c0_i32_1 = arith.constant 0 : i32
    return %c0_i32, %c0_i32_0 : i32, i32
  }
  func.func @transform_3(%arg0: i32) -> (i32, i32) {
    %c0_i32 = arith.constant 0 : i32
    %c0_i32_0 = arith.constant 0 : i32
    return %arg0, %c0_i32 : i32, i32
  }
}

</mosaic_0001>

<bundles_post_ra>
// kernel: tpu_custom_call.1
= control target key start
LH: loop header
LB: loop body
LE: loop exit
PB: predicated region body
PF: predicated region fallthrough
CT: control target
= control target key end

     0   :  { %8 = vsyncpa [#allocation3], 0  ;;  %s207_s0 = inlined_call_operand.hbm [shape: f32[16,32], index: 0, kind: input, shape index: {}]   ;;  %s208_s1 = inlined_call_operand.vmem [shape: f32[1,32], index: 1, kind: input, shape index: {}]   ;;  %s209_s2 = inlined_call_operand.vmem [shape: f32[1,32], index: 2, kind: input, shape index: {}]   ;;  %s210_s3 = inlined_call_operand.hbm [shape: bf16[16,32], index: 3, kind: output, shape index: {}]  }
   0x1   :  { %9 = vsyncpa [#allocation4], 0  ;;  %s165_s12 = smov [#allocation2]  }
   0x2   :  { %s15_s13 = sshll.u32 %s165_s12, 4  ;;  %s16_s13 = int_to_ptr.vmem [resolvable:$true] %s15_s13 }
   0x3   :  { %s129_s14 = scalar_lea.vmem %s16_s13, 256  ;;  %p134_p1 = scmp.lt.s32.totalorder %s16_s13, %s16_s13 }
   0x4   :  { %p130_p0 = scmp.ne.s32.totalorder %s16_s13, %s129_s14  ;;  %p135_p2 = scmp.lt.s32.totalorder %s129_s14, %s129_s14 }
   0x6   :  { %p136_p3 = por %p135_p2, %p134_p1 }
   0x8   :  { %p137_p4 = pnand %p136_p3, %p130_p0 }
   0xa   :  { %140 = shalt.err (!%p137_p4)
}
   0xb   :  { %s166_s15 = smov 128   ;;  %s167_s16 = smov 8  }
   0xc   :  { %21 = dma.hbm_to_vmem [thread:$0]  %s207_s0, 256, %s16_s13, [#allocation3], %s166_s15, %s166_s15, %s167_s16  }
   0xd   :  { %161 = dma.done.wait [#allocation3], 256  }
   0xe   :  { %162 = vsyncadd [#allocation3], 4294967040  ;;  %vm33_vm0 = vcmask 261120   ;;  %v29_v0 = vld [vmem:[#allocation2] sm:$0xff]  ;;  %v30_v1 = vld [vmem:[#allocation2 + $0x8] sm:$0xff]  ;;  %vm85_vm1 = vcmask 257024  }
   0xf   :  { %v34_v2 = vsel %vm33_vm0, %v29_v0, 0.0  ;;  %v37_v3 = vsel %vm33_vm0, %v30_v1, 0.0  ;;  %v105_v21 = vld [vmem:[%s208_s1] ss:$0 sm:$0xff]  ;;  %s168_s22 = smov [#allocation5]  }
  0x10   :  { %35 = vadd.xlane.f32.xlu0 %v34_v2  ;;  %v106_v23 = vld [vmem:[%s209_s2] ss:$0 sm:$0xff]  ;;  %s93_s23 = sshll.u32 %s168_s22, 4  ;;  %s94_s23 = int_to_ptr.vmem [resolvable:$true] %s93_s23 }
  0x11   :  { %s141_s1 = scalar_lea.vmem %s94_s23, 128  ;;  %p146_p6 = scmp.lt.s32.totalorder %s94_s23, %s94_s23 }
  0x12   :  { %p142_p5 = scmp.ne.s32.totalorder %s94_s23, %s141_s1  ;;  %p147_p7 = scmp.lt.s32.totalorder %s141_s1, %s141_s1 }
  0x14   :  { %38 = vadd.xlane.f32.xlu0 %v37_v3  ;;  %p148_p8 = por %p147_p7, %p146_p6 }
  0x16   :  { %p149_p9 = pnand %p148_p8, %p142_p5 }
  0x99   :  { %v36_v4 = vpop.xlane.xlu0 %35 }
  0x9a   :  { %v41_v5 = vmul.f32 0.03125, %v36_v4 }
  0x9c   :  { %v43_v6 = vsub.f32 %v29_v0, %v41_v5 }
  0x9d   :  { %v39_v7 = vpop.xlane.xlu0 %38 }
  0x9e   :  { %v42_v8 = vmul.f32 0.03125, %v39_v7  ;;  %v45_v9 = vmul.f32 %v43_v6, %v43_v6 }
  0xa0   :  { %v44_v10 = vsub.f32 %v30_v1, %v42_v8  ;;  %v47_v11 = vsel %vm33_vm0, %v45_v9, 0.0 }
  0xa1   :  { %48 = vadd.xlane.f32.xlu1 %v47_v11 }
  0xa2   :  { %v46_v12 = vmul.f32 %v44_v10, %v44_v10 }
  0xa4   :  { %v50_v13 = vsel %vm33_vm0, %v46_v12, 0.0 }
  0xa5   :  { %51 = vadd.xlane.f32.xlu1 %v50_v13 }
 0x12a   :  { %v49_v14 = vpop.xlane.xlu1 %48 }
 0x12b   :  { %v53_v15 = vmul.f32 0.03125, %v49_v14 }
 0x12d   :  { %v55_v16 = vadd.f32 1e-12, %v53_v15 }
 0x12e   :  { %v52_v17 = vpop.xlane.xlu1 %51 }
 0x12f   :  { %117 = vrsqrt.f32 %v55_v16  ;;  %v54_v18 = vmul.f32 0.03125, %v52_v17 }
 0x131   :  { %v56_v19 = vadd.f32 1e-12, %v54_v18 }
 0x133   :  { %119 = vrsqrt.f32 %v56_v19 }
 0x13c   :  { %v118_v20 = vpop.eup %117 }
 0x13d   :  { %v59_v22 = vmul.f32 %v118_v20, %v43_v6 }
 0x13f   :  { %v67_v24 = vmul.f32 %v105_v21, %v59_v22 }
 0x140   :  { %v120_v25 = vpop.eup %119 }
 0x141   :  { %v60_v26 = vmul.f32 %v120_v25, %v44_v10  ;;  %v75_v27 = vadd.f32 %v106_v23, %v67_v24 }
 0x143   :  { %v68_v28 = vmul.f32 %v105_v21, %v60_v26  ;;  %v109_v29 = vpack.c.bf16 %v75_v27, %v75_v27 }
 0x145   :  { %v76_v30 = vadd.f32 %v106_v23, %v68_v28  ;;  %86 = vst.msk [vmem:[#allocation5] sm:$0xf] %vm85_vm1, %v109_v29 }
 0x147   :  { %v110_v31 = vpack.c.bf16 %v76_v30, %v76_v30 }
 0x149   :  { %87 = vst.msk [vmem:[#allocation5 + $0x4] sm:$0xf] %vm85_vm1, %v110_v31 }
 0x14a   :  { %152 = shalt.err (!%p149_p9)
}
 0x14b   :  { %s169_s2 = smov 64   ;;  %s170_s24 = smov 4  }
 0x14c   :  { %99 = dma.vmem_to_hbm [thread:$0]  %s94_s23, 128, %s210_s3, [#allocation4], %s169_s2, %s169_s2, %s170_s24  }
 0x14d   :  { %163 = dma.done.wait [#allocation4], 128  }
 0x14e   :  { %164 = vsyncadd [#allocation4], 4294967168 }
 0x14f   :  { %103 = vsyncpa [#allocation3], 1 }
 0x150   :  { %104 = vsyncpa [#allocation4], 1 }

</bundles_post_ra>
